<compile_context>
chip_gen: v7x
topology: tpu7x:2x2x1
jax: 0.10.0
libtpu: 0.0.40
codegen_flags: <defaults>
</compile_context>

<pallas_src>
import functools

import jax
import jax.numpy as jnp
from jax import lax
from jax.experimental import pallas as pl
from jax.experimental.pallas import tpu as pltpu


def _taps(kh, kw):
    return [(dh, dw) for dh in range(kh) for dw in range(kw)]


def _im2col_seq(x, kh, kw, pad):
    """(B, T, H, W, C) -> (B, T, H*W, kh*kw*C) with zero spatial padding."""
    B, T, H, W, C = x.shape
    xp = jnp.pad(x, ((0, 0), (0, 0), (pad, pad), (pad, pad), (0, 0)))
    cols = [xp[:, :, dh:dh + H, dw:dw + W, :] for dh, dw in _taps(kh, kw)]
    return jnp.concatenate(cols, axis=-1).reshape(B, T, H * W, kh * kw * C)


def _im2col_frame(x, kh, kw, pad):
    """(B, H, W, C) -> (B*H*W, kh*kw*C) with zero spatial padding."""
    B, H, W, C = x.shape
    xp = jnp.pad(x, ((0, 0), (pad, pad), (pad, pad), (0, 0)))
    cols = [xp[:, dh:dh + H, dw:dw + W, :] for dh, dw in _taps(kh, kw)]
    return jnp.concatenate(cols, axis=-1).reshape(B * H * W, kh * kw * C)


def _toeplitz_wh(wh_fold, kh, kw, Cout, W, pad):
    """Fold the hidden->gates conv into kh banded matrices.

    wh_fold: (kh*kw*Cout, 4*Cout), K rows ordered tap-major, channel-minor.
    Returns (kh, W*Cout, 4*W*Cout): for row offset dh, maps one lane-dense
    hidden row slab (W*Cout lanes) to the lane-dense gate pre-activations of
    one output row, columns ordered (gate, output column j, channel).  The
    band mask absorbs the zero padding along W.
    """
    whc = wh_fold.reshape(kh, kw, Cout, 4, Cout)          # [dh, dw, ci, gate, cc]
    w_idx = jnp.arange(W)[:, None]                        # source column
    j_idx = jnp.arange(W)[None, :]                        # output column
    dwi = w_idx - j_idx + pad                             # tap offset dw
    valid = (dwi >= 0) & (dwi < kw)
    dwc = jnp.clip(dwi, 0, kw - 1)
    g = whc[:, dwc]                                       # (kh, W, W, Cout, 4, Cout)
    g = g * valid[None, :, :, None, None, None].astype(whc.dtype)
    g = jnp.transpose(g, (0, 1, 3, 4, 2, 5))              # (kh, W, ci, gate, j, cc)
    return g.reshape(kh, W * Cout, 4 * W * Cout)


# ---------------------------------------------------------------------------
# Fused ConvLSTM layer: whole sequence in one pallas_call, grid=(B,).
# ---------------------------------------------------------------------------
def make_convlstm_layer_call(B, T, H, W, Cout, kh, pad):
    WC = W * Cout
    C4W = 4 * WC
    Hp = H + 2 * pad

    def layer_kernel(xproj_ref, whb_ref, wci_ref, wcf_ref, wco_ref,
                     hseq_ref, hpad_ref):
        # Fresh recurrent state for this batch element (zero halo rows give
        # the H-direction padding for every step).
        hpad_ref[...] = jnp.zeros_like(hpad_ref)

        wci = wci_ref[...]
        wcf = wcf_ref[...]
        wco = wco_ref[...]

        def step(t, c_prev):
            # Hidden-path conv: kh lane-dense bf16 matmuls on the row-padded
            # previous hidden state; the Toeplitz-folded weights already emit
            # the gates in lane-dense (gate, column, channel) layout.
            acc = xproj_ref[t]                              # (H, 4*W*Cout) f32
            for dh in range(kh):                            # static, small
                acc = acc + jnp.dot(hpad_ref[dh:dh + H, :], whb_ref[dh],
                                    preferred_element_type=jnp.float32)

            # Gate / cell math on fully lane-dense (H, W*Cout) tensors.
            i_g = jax.nn.sigmoid(acc[:, 0:WC] + wci * c_prev)
            f_g = jax.nn.sigmoid(acc[:, WC:2 * WC] + wcf * c_prev)
            c_new = f_g * c_prev + i_g * jnp.tanh(acc[:, 2 * WC:3 * WC])
            o_g = jax.nn.sigmoid(acc[:, 3 * WC:4 * WC] + wco * c_new)
            h_new = o_g * jnp.tanh(c_new)                   # (H, W*Cout) f32

            # Interior-only store; halo rows stay zero from the init.
            hpad_ref[pad:pad + H, :] = h_new.astype(hpad_ref.dtype)
            # Lane-dense, unmasked store of this timestep's hidden state.
            hseq_ref[t] = h_new
            return c_new

        lax.fori_loop(0, T, step, jnp.zeros((H, WC), jnp.float32))

    return pl.pallas_call(
        layer_kernel,
        grid=(B,),
        in_specs=[
            pl.BlockSpec((None, T, H, C4W), lambda b: (b, 0, 0, 0)),  # xproj
            pl.BlockSpec((kh, WC, C4W), lambda b: (0, 0, 0)),         # Toeplitz Wh
            pl.BlockSpec((H, WC), lambda b: (0, 0)),                  # Wci
            pl.BlockSpec((H, WC), lambda b: (0, 0)),                  # Wcf
            pl.BlockSpec((H, WC), lambda b: (0, 0)),                  # Wco
        ],
        out_specs=pl.BlockSpec((None, T, H, WC), lambda b: (b, 0, 0, 0)),
        out_shape=jax.ShapeDtypeStruct((B, T, H, WC), jnp.float32),
        scratch_shapes=[pltpu.VMEM((Hp, WC), jnp.bfloat16)],  # row-padded h
        compiler_params=pltpu.CompilerParams(
            dimension_semantics=("parallel",),
            vmem_limit_bytes=32 * 1024 * 1024),
    )


# ---------------------------------------------------------------------------
# Parameter init (deterministic, synthetic; weights in folded im2col layout:
# (kh*kw*Cin, 4*Cout) etc., tap-major / channel-minor, gate order i,f,g,o).
# ---------------------------------------------------------------------------
def init_params(key, num_channels, num_kernels, kernel_size, frame_size,
                num_layers):
    kh = kw = kernel_size
    H, W = frame_size
    params = {"layers": []}
    for layer_idx in range(num_layers):
        cin = num_channels if layer_idx == 0 else num_kernels
        key, *ks = jax.random.split(key, 7)
        layer = {
            "wx":  0.1 * jax.random.normal(ks[0], (kh * kw * cin, 4 * num_kernels), jnp.float32),
            "wh":  0.1 * jax.random.normal(ks[1], (kh * kw * num_kernels, 4 * num_kernels), jnp.float32),
            "b":   0.1 * jax.random.normal(ks[2], (1, 4 * num_kernels), jnp.float32),
            "wci": 0.1 * jax.random.normal(ks[3], (H * W, num_kernels), jnp.float32),
            "wcf": 0.1 * jax.random.normal(ks[4], (H * W, num_kernels), jnp.float32),
            "wco": 0.1 * jax.random.normal(ks[5], (H * W, num_kernels), jnp.float32),
            "bn_gamma": jnp.ones((num_kernels,), jnp.float32),   # PyTorch default
            "bn_beta":  jnp.zeros((num_kernels,), jnp.float32),
        }
        params["layers"].append(layer)
    key, k1, k2 = jax.random.split(key, 3)
    params["conv_w"] = 0.1 * jax.random.normal(
        k1, (kh * kw * num_kernels, num_channels), jnp.float32)
    params["conv_b"] = 0.1 * jax.random.normal(
        k2, (1, num_channels), jnp.float32)
    return params


# ---------------------------------------------------------------------------
# Seq2SeqImage.forward
# ---------------------------------------------------------------------------
def seq2seq_image_forward(X, params, kernel_size, padding):
    # X: (B, num_channels, T, H, W) — PyTorch NCTHW; returns (B, C, H, W).
    B, Cn, T, H, W = X.shape
    kh = kw = kernel_size
    x = jnp.transpose(X, (0, 2, 3, 4, 1)).astype(jnp.float32)   # (B,T,H,W,C)

    n_layers = len(params["layers"])
    last = None
    for li, p in enumerate(params["layers"]):
        Cout = p["wci"].shape[-1]
        WC = W * Cout

        # Hoisted X-path projection for all (B,T) steps (one big matmul);
        # XLA fuses the previous layer's BN scale/shift + pad + im2col here.
        xcol = _im2col_seq(x, kh, kw, padding)                  # (B,T,HW,K)
        xproj = jnp.dot(xcol, p["wx"],
                        preferred_element_type=jnp.float32) + p["b"]
        xproj = xproj.reshape(B, T, H, W, 4, Cout)
        xproj = jnp.transpose(xproj, (0, 1, 2, 4, 3, 5)).reshape(B, T, H, 4 * WC)

        whb = _toeplitz_wh(p["wh"], kh, kw, Cout, W, padding).astype(jnp.bfloat16)
        wci_d = p["wci"].reshape(H, WC)
        wcf_d = p["wcf"].reshape(H, WC)
        wco_d = p["wco"].reshape(H, WC)

        layer_call = make_convlstm_layer_call(B, T, H, W, Cout, kh, padding)
        hseq = layer_call(xproj, whb, wci_d, wcf_d, wco_d)      # (B,T,H,WC)
        h5 = hseq.reshape(B, T, H, W, Cout)

        # BatchNorm3d (train-mode batch statistics, biased variance, eps=1e-5),
        # applied as a per-channel scale/shift fused by XLA with the next
        # layer's input preparation.
        mean = jnp.mean(h5, axis=(0, 1, 2, 3))
        var = jnp.maximum(jnp.var(h5, axis=(0, 1, 2, 3)), 0.0)
        scale = p["bn_gamma"] * lax.rsqrt(var + 1e-5)
        shift = p["bn_beta"] - mean * scale
        if li + 1 < n_layers:
            x = h5 * scale + shift
        else:
            last = h5[:, -1] * scale + shift                    # (B,H,W,Cout)

    # Final 3x3 conv + sigmoid on the last hidden frame (~0.3 MFLOP): left to
    # XLA (fused pad + im2col + matmul) — a dedicated kernel launch costs more
    # than the work itself.
    lcol = _im2col_frame(last, kh, kw, padding)                 # (B*H*W, K)
    out = jax.nn.sigmoid(
        jnp.dot(lcol, params["conv_w"], preferred_element_type=jnp.float32)
        + params["conv_b"])
    return out.reshape(B, H, W, Cn).transpose(0, 3, 1, 2)


if __name__ == "__main__":
    num_channels = 4
    num_kernels = 8
    kernel_size = 3
    padding = 1
    frame_size = (16, 16)
    num_layers = 2
    batch, seq_len = 2, 8

    key = jax.random.PRNGKey(0)
    kx, kp = jax.random.split(key)
    X = jax.random.uniform(
        kx, (batch, num_channels, seq_len, *frame_size), dtype=jnp.float32)
    params = init_params(kp, num_channels, num_kernels, kernel_size,
                         frame_size, num_layers)

    fwd = jax.jit(functools.partial(
        seq2seq_image_forward, kernel_size=kernel_size, padding=padding))
    out = fwd(X, params)
    out = jax.block_until_ready(out)
    assert out.shape == (batch, num_channels, *frame_size), out.shape
    assert bool(jnp.all(jnp.isfinite(out)))
    assert bool(jnp.all((out >= 0.0) & (out <= 1.0)))   # sigmoid output range
    print("KERNEL_OK")
</pallas_src>

<mosaic_0001>
module attributes {stable_mosaic.version = 11 : i64} {
  func.func @layer_kernel(%arg0: i32, %arg1: memref<1x8x16x512xf32, #tpu.memory_space<vmem>>, %arg2: memref<3x128x512xbf16, #tpu.memory_space<vmem>>, %arg3: memref<16x128xf32, #tpu.memory_space<vmem>>, %arg4: memref<16x128xf32, #tpu.memory_space<vmem>>, %arg5: memref<16x128xf32, #tpu.memory_space<vmem>>, %arg6: memref<1x8x16x128xf32, #tpu.memory_space<vmem>>, %arg7: memref<18x128xbf16, #tpu.memory_space<vmem>>) attributes {dimension_semantics = [#tpu.dimension_semantics<parallel>], iteration_bounds = array<i64: 2>, scalar_prefetch = 0 : i64, scratch_operands = 1 : i64, tpu.core_type = #tpu.core_type<tc>, window_params = [{transform_indices = @transform_0, window_bounds = array<i64: 1, 8, 16, 512>}, {pipeline_mode = #tpu.pipeline_mode<synchronous>, transform_indices = @transform_1, window_bounds = array<i64: 3, 128, 512>}, {pipeline_mode = #tpu.pipeline_mode<synchronous>, transform_indices = @transform_2, window_bounds = array<i64: 16, 128>}, {pipeline_mode = #tpu.pipeline_mode<synchronous>, transform_indices = @transform_3, window_bounds = array<i64: 16, 128>}, {pipeline_mode = #tpu.pipeline_mode<synchronous>, transform_indices = @transform_4, window_bounds = array<i64: 16, 128>}, {transform_indices = @transform_5, window_bounds = array<i64: 1, 8, 16, 128>}]} {
    %cst = arith.constant 0.000000e+00 : bf16
    %0 = vector.broadcast %cst : bf16 to vector<18x128xbf16>
    %c0 = arith.constant 0 : index
    %c0_0 = arith.constant 0 : index
    %1 = vector.load %arg7[%c0, %c0_0] : memref<18x128xbf16, #tpu.memory_space<vmem>>, vector<18x128xbf16>
    tpu.vector_store %arg7[%c0, %c0_0], %0 {strides = array<i32>} : memref<18x128xbf16, #tpu.memory_space<vmem>>, vector<18x128xbf16>,
    %c0_1 = arith.constant 0 : index
    %c0_2 = arith.constant 0 : index
    %2 = vector.load %arg3[%c0_1, %c0_2] : memref<16x128xf32, #tpu.memory_space<vmem>>, vector<16x128xf32>
    %c0_3 = arith.constant 0 : index
    %c0_4 = arith.constant 0 : index
    %3 = vector.load %arg4[%c0_3, %c0_4] : memref<16x128xf32, #tpu.memory_space<vmem>>, vector<16x128xf32>
    %c0_5 = arith.constant 0 : index
    %c0_6 = arith.constant 0 : index
    %4 = vector.load %arg5[%c0_5, %c0_6] : memref<16x128xf32, #tpu.memory_space<vmem>>, vector<16x128xf32>
    %cst_7 = arith.constant 0.000000e+00 : f32
    %5 = vector.broadcast %cst_7 : f32 to vector<16x128xf32>
    %c0_i32 = arith.constant 0 : i32
    %c8_i32 = arith.constant 8 : i32
    %6 = arith.addi %c0_i32, %c8_i32 : i32
    %c1_i32 = arith.constant 1 : i32
    %7 = scf.for %arg8 = %c0_i32 to %6 step %c1_i32 iter_args(%arg9 = %5) -> (vector<16x128xf32>)  : i32 {
      %c0_9 = arith.constant 0 : index
      %8 = arith.index_cast %arg8 : i32 to index
      %c0_10 = arith.constant 0 : index
      %c0_11 = arith.constant 0 : index
      %9 = vector.load %arg1[%c0_9, %8, %c0_10, %c0_11] : memref<1x8x16x512xf32, #tpu.memory_space<vmem>>, vector<1x1x16x512xf32>
      %10 = vector.shape_cast %9 : vector<1x1x16x512xf32> to vector<16x512xf32>
      %c0_12 = arith.constant 0 : index
      %c0_13 = arith.constant 0 : index
      %11 = vector.load %arg7[%c0_12, %c0_13] : memref<18x128xbf16, #tpu.memory_space<vmem>>, vector<16x128xbf16>
      %c0_14 = arith.constant 0 : index
      %c0_15 = arith.constant 0 : index
      %c0_16 = arith.constant 0 : index
      %12 = vector.load %arg2[%c0_14, %c0_15, %c0_16] : memref<3x128x512xbf16, #tpu.memory_space<vmem>>, vector<1x128x512xbf16>
      %13 = vector.shape_cast %12 : vector<1x128x512xbf16> to vector<128x512xbf16>
      %cst_17 = arith.constant dense<0.000000e+00> : vector<16x512xf32>
      %14 = tpu.matmul %11, %13, %cst_17 {dimension_numbers = #tpu.dot_dimension_numbers<[1], [0], [0], [1], [0, 0, 1, 1], [], []>} : vector<16x128xbf16>, vector<128x512xbf16>, vector<16x512xf32> -> vector<16x512xf32>
      %15 = arith.addf %10, %14 : vector<16x512xf32>
      %c1 = arith.constant 1 : index
      %c0_18 = arith.constant 0 : index
      %16 = vector.load %arg7[%c1, %c0_18] : memref<18x128xbf16, #tpu.memory_space<vmem>>, vector<16x128xbf16>
      %c1_19 = arith.constant 1 : index
      %c0_20 = arith.constant 0 : index
      %c0_21 = arith.constant 0 : index
      %17 = vector.load %arg2[%c1_19, %c0_20, %c0_21] : memref<3x128x512xbf16, #tpu.memory_space<vmem>>, vector<1x128x512xbf16>
      %18 = vector.shape_cast %17 : vector<1x128x512xbf16> to vector<128x512xbf16>
      %cst_22 = arith.constant dense<0.000000e+00> : vector<16x512xf32>
      %19 = tpu.matmul %16, %18, %cst_22 {dimension_numbers = #tpu.dot_dimension_numbers<[1], [0], [0], [1], [0, 0, 1, 1], [], []>} : vector<16x128xbf16>, vector<128x512xbf16>, vector<16x512xf32> -> vector<16x512xf32>
      %20 = arith.addf %15, %19 : vector<16x512xf32>
      %c2 = arith.constant 2 : index
      %c0_23 = arith.constant 0 : index
      %21 = vector.load %arg7[%c2, %c0_23] : memref<18x128xbf16, #tpu.memory_space<vmem>>, vector<16x128xbf16>
      %c2_24 = arith.constant 2 : index
      %c0_25 = arith.constant 0 : index
      %c0_26 = arith.constant 0 : index
      %22 = vector.load %arg2[%c2_24, %c0_25, %c0_26] : memref<3x128x512xbf16, #tpu.memory_space<vmem>>, vector<1x128x512xbf16>
      %23 = vector.shape_cast %22 : vector<1x128x512xbf16> to vector<128x512xbf16>
      %cst_27 = arith.constant dense<0.000000e+00> : vector<16x512xf32>
      %24 = tpu.matmul %21, %23, %cst_27 {dimension_numbers = #tpu.dot_dimension_numbers<[1], [0], [0], [1], [0, 0, 1, 1], [], []>} : vector<16x128xbf16>, vector<128x512xbf16>, vector<16x512xf32> -> vector<16x512xf32>
      %25 = arith.addf %20, %24 : vector<16x512xf32>
      %26 = vector.extract_strided_slice %25 {offsets = [0, 0], sizes = [16, 128], strides = [1, 1]} : vector<16x512xf32> to vector<16x128xf32>
      %27 = arith.mulf %2, %arg9 : vector<16x128xf32>
      %28 = arith.addf %26, %27 : vector<16x128xf32>
      %29 = arith.negf %28 : vector<16x128xf32>
      %30 = math.exp %29 : vector<16x128xf32>
      %cst_28 = arith.constant 1.000000e+00 : f32
      %31 = vector.broadcast %cst_28 : f32 to vector<16x128xf32>
      %32 = arith.addf %31, %30 : vector<16x128xf32>
      %33 = arith.divf %31, %32 : vector<16x128xf32>
      %34 = vector.extract_strided_slice %25 {offsets = [0, 128], sizes = [16, 128], strides = [1, 1]} : vector<16x512xf32> to vector<16x128xf32>
      %35 = arith.mulf %3, %arg9 : vector<16x128xf32>
      %36 = arith.addf %34, %35 : vector<16x128xf32>
      %37 = arith.negf %36 : vector<16x128xf32>
      %38 = math.exp %37 : vector<16x128xf32>
      %cst_29 = arith.constant 1.000000e+00 : f32
      %39 = vector.broadcast %cst_29 : f32 to vector<16x128xf32>
      %40 = arith.addf %39, %38 : vector<16x128xf32>
      %41 = arith.divf %39, %40 : vector<16x128xf32>
      %42 = arith.mulf %41, %arg9 : vector<16x128xf32>
      %43 = vector.extract_strided_slice %25 {offsets = [0, 256], sizes = [16, 128], strides = [1, 1]} : vector<16x512xf32> to vector<16x128xf32>
      %44 = math.tanh %43 : vector<16x128xf32>
      %45 = arith.mulf %33, %44 : vector<16x128xf32>
      %46 = arith.addf %42, %45 : vector<16x128xf32>
      %47 = vector.extract_strided_slice %25 {offsets = [0, 384], sizes = [16, 128], strides = [1, 1]} : vector<16x512xf32> to vector<16x128xf32>
      %48 = arith.mulf %4, %46 : vector<16x128xf32>
      %49 = arith.addf %47, %48 : vector<16x128xf32>
      %50 = arith.negf %49 : vector<16x128xf32>
      %51 = math.exp %50 : vector<16x128xf32>
      %cst_30 = arith.constant 1.000000e+00 : f32
      %52 = vector.broadcast %cst_30 : f32 to vector<16x128xf32>
      %53 = arith.addf %52, %51 : vector<16x128xf32>
      %54 = arith.divf %52, %53 : vector<16x128xf32>
      %55 = math.tanh %46 : vector<16x128xf32>
      %56 = arith.mulf %54, %55 : vector<16x128xf32>
      %57 = arith.truncf %56 : vector<16x128xf32> to vector<16x128xbf16>
      %c1_31 = arith.constant 1 : index
      %c0_32 = arith.constant 0 : index
      %58 = vector.load %arg7[%c1_31, %c0_32] : memref<18x128xbf16, #tpu.memory_space<vmem>>, vector<16x128xbf16>
      tpu.vector_store %arg7[%c1_31, %c0_32], %57 {strides = array<i32>} : memref<18x128xbf16, #tpu.memory_space<vmem>>, vector<16x128xbf16>,
      %c0_33 = arith.constant 0 : index
      %59 = arith.index_cast %arg8 : i32 to index
      %c0_34 = arith.constant 0 : index
      %c0_35 = arith.constant 0 : index
      %60 = vector.load %arg6[%c0_33, %59, %c0_34, %c0_35] : memref<1x8x16x128xf32, #tpu.memory_space<vmem>>, vector<1x1x16x128xf32>
      %61 = vector.shape_cast %60 : vector<1x1x16x128xf32> to vector<16x128xf32>
      %62 = vector.shape_cast %56 : vector<16x128xf32> to vector<1x1x16x128xf32>
      tpu.vector_store %arg6[%c0_33, %59, %c0_34, %c0_35], %62 {strides = array<i32>} : memref<1x8x16x128xf32, #tpu.memory_space<vmem>>, vector<1x1x16x128xf32>,
      scf.yield %46 : vector<16x128xf32>
    }
    %c8_i32_8 = arith.constant 8 : i32
    return
  }
  func.func @transform_0(%arg0: i32) -> (i32, i32, i32, i32) {
    %c0_i32 = arith.constant 0 : i32
    %c0_i32_0 = arith.constant 0 : i32
    %c0_i32_1 = arith.constant 0 : i32
    %c0_i32_2 = arith.constant 0 : i32
    return %arg0, %c0_i32, %c0_i32_0, %c0_i32_1 : i32, i32, i32, i32
  }
  func.func @transform_1(%arg0: i32) -> (i32, i32, i32) {
    %c0_i32 = arith.constant 0 : i32
    %c0_i32_0 = arith.constant 0 : i32
    %c0_i32_1 = arith.constant 0 : i32
    %c0_i32_2 = arith.constant 0 : i32
    return %c0_i32, %c0_i32_0, %c0_i32_1 : i32, i32, i32
  }
  func.func @transform_2(%arg0: i32) -> (i32, i32) {
    %c0_i32 = arith.constant 0 : i32
    %c0_i32_0 = arith.constant 0 : i32
    %c0_i32_1 = arith.constant 0 : i32
    return %c0_i32, %c0_i32_0 : i32, i32
  }
  func.func @transform_3(%arg0: i32) -> (i32, i32) {
    %c0_i32 = arith.constant 0 : i32
    %c0_i32_0 = arith.constant 0 : i32
    %c0_i32_1 = arith.constant 0 : i32
    return %c0_i32, %c0_i32_0 : i32, i32
  }
  func.func @transform_4(%arg0: i32) -> (i32, i32) {
    %c0_i32 = arith.constant 0 : i32
    %c0_i32_0 = arith.constant 0 : i32
    %c0_i32_1 = arith.constant 0 : i32
    return %c0_i32, %c0_i32_0 : i32, i32
  }
  func.func @transform_5(%arg0: i32) -> (i32, i32, i32, i32) {
    %c0_i32 = arith.constant 0 : i32
    %c0_i32_0 = arith.constant 0 : i32
    %c0_i32_1 = arith.constant 0 : i32
    %c0_i32_2 = arith.constant 0 : i32
    return %arg0, %c0_i32, %c0_i32_0, %c0_i32_1 : i32, i32, i32, i32
  }
}

</mosaic_0001>

<bundles_post_ra>
// kernel: seq2seq_image_forward.2
= control target key start
LH: loop header
LB: loop body
LE: loop exit
PB: predicated region body
PF: predicated region fallthrough
CT: control target
= control target key end

     0   :  { %s1823_s18 = smov 0   ;;  %s2228_s0 = inlined_call_operand.vmem [shape: f32[2,8,16,512], index: 0, kind: input, shape index: {}]   ;;  %s2229_s1 = inlined_call_operand.vmem [shape: bf16[3,128,512], index: 1, kind: input, shape index: {}]   ;;  %s2230_s2 = inlined_call_operand.vmem [shape: f32[16,128], index: 2, kind: input, shape index: {}]   ;;  %s2231_s3 = inlined_call_operand.vmem [shape: f32[16,128], index: 3, kind: input, shape index: {}]   ;;  %s2232_s4 = inlined_call_operand.vmem [shape: f32[16,128], index: 4, kind: input, shape index: {}]   ;;  %s2233_s5 = inlined_call_operand.vmem [shape: f32[2,8,16,128], index: 5, kind: output, shape index: {}]  }
   0x1 LB: > { %s1330_s19 = sadd.s32 4294967295, %s1777_s18   ;;  %p1334_p0 = scmp.ge.s32.totalorder %s1777_s18, 1  ;;  %s1777_s18 = sphi %s1823_s18, %s15_s18  }
   0x2   : > { %p187_p1 = scmp.lt.s32.totalorder %s1777_s18, 3 }
   0x4   : > { %p188_p2 = pnand %p1334_p0, %p187_p1 }
   0x5   : > { %p215_p3 = scmp.lt.s32.totalorder (!%p188_p2), %s1330_s19, 1  ;;  %v1834_v0 = vld [vmem:[%s2230_s2] sm:$0xff] (!%p188_p2)  ;;  %v1839_v1 = vld [vmem:[%s2230_s2 + $0x8] sm:$0xff] (!%p188_p2)  ;;  %v1791_v3 = vmov (!%p188_p2), 0   ;;  %v1871_v7 = vmov (!%p188_p2), 0.0   ;;  %v1873_v8 = vmov (!%p188_p2), 0.0  }
   0x6   : > { %191 = sbr.rel (%p188_p2) target bundleno = 405 (0x195), region = 40  ;;  %v1844_v2 = vld [vmem:[%s2231_s3] sm:$0xff] (!%p188_p2)  ;;  %226 = vst [vmem:[#allocation2] sm:$0xf] (!%p188_p2), %v1791_v3  ;;  %227 = vst [vmem:[#allocation2 + $0x4] sm:$0xf] (!%p188_p2), %v1791_v3 }
   0x7   : > { %228 = vst [vmem:[#allocation2 + $0x8] sm:$0x1] (!%p188_p2), %v1791_v3  ;;  %v1849_v4 = vld [vmem:[%s2231_s3 + $0x8] sm:$0xff] (!%p188_p2)  ;;  %v1854_v5 = vld [vmem:[%s2232_s4] sm:$0xff] (!%p188_p2)  ;;  %s1875_s15 = smov (!%p188_p2), 0  }
   0x8   : > { %v1859_v6 = vld [vmem:[%s2232_s4 + $0x8] sm:$0xff] (!%p188_p2) }
   0xd   : > { %s2235_s19 = smov (!%p215_p3, %s1330_s19), 1 }
   0xe   : > { %s1516_s7 = sshll.u32 %s2235_s19, 9  ;;  %s1517_s8 = sshll.u32 %s2235_s19, 7 }
   0xf   : > { %s1864_s11 = scalar_lea.vmem %s2228_s0, %s1516_s7  ;;  %s1869_s14 = scalar_lea.vmem %s2233_s5, %s1517_s8 }
  0x10 LB: >> { %v1579_v9 = vld [vmem:[%s2229_s1 + $0x4] ss:$16 sps:$4 sm:$0xff]   ;;  %v1581_v10 = vld [vmem:[%s2229_s1 + $0xc] ss:$16 sps:$4 sm:$0xff]   ;;  %v1792_v11 = vmov 0   ;;  %vm897_vm1 = vcmask 1046528   ;;  %s1789_s15 = sphi %s1875_s15, %s240_s15   ;;  %v1785_v8 = vphi %v1873_v8, %v1194_v8   ;;  %v1781_v7 = vphi %v1871_v7, %v1195_v7  }
  0x11   : >> { %486 = vmatprep.mubr.bf16.mxu0 %v1792_v11  ;;  %529 = vmatprep.mubr.bf16.mxu1 %v1792_v11  ;;  %v1583_v12 = vld [vmem:[%s2229_s1] ss:$16 sps:$4 sm:$0xff]   ;;  %v1584_v13 = vld [vmem:[%s2229_s1 + $0x8] ss:$16 sps:$4 sm:$0xff]   ;;  %v1585_v14 = vld [vmem:[%s2229_s1 + $0x24] ss:$16 sps:$4 sm:$0xff]  }
  0x12   : >> { %454 = vmatprep.subr.bf16.mxu0 %v1579_v9  ;;  %497 = vmatprep.subr.bf16.mxu1 %v1581_v10  ;;  %v1587_v15 = vld [vmem:[%s2229_s1 + $0x2c] ss:$16 sps:$4 sm:$0xff]   ;;  %v1589_v16 = vld [vmem:[%s2229_s1 + $0x20] ss:$16 sps:$4 sm:$0xff]   ;;  %v1590_v17 = vld [vmem:[%s2229_s1 + $0x28] ss:$16 sps:$4 sm:$0xff]  }
  0x13   : >> { %455 = vmatpush1.bf16.msra.mxu0 %v1583_v12  ;;  %498 = vmatpush1.bf16.msra.mxu1 %v1584_v13  ;;  %v1591_v18 = vld [vmem:[%s2229_s1 + $0x44] ss:$16 sps:$4 sm:$0xff]   ;;  %v1593_v19 = vld [vmem:[%s2229_s1 + $0x4c] ss:$16 sps:$4 sm:$0xff]   ;;  %v1595_v20 = vld [vmem:[%s2229_s1 + $0x40] ss:$16 sps:$4 sm:$0xff]  }
  0x14   : >> { %456 = vmatprep.subr.bf16.mxu0 %v1585_v14  ;;  %499 = vmatprep.subr.bf16.mxu1 %v1587_v15  ;;  %v1596_v21 = vld [vmem:[%s2229_s1 + $0x48] ss:$16 sps:$4 sm:$0xff]   ;;  %v1597_v22 = vld [vmem:[%s2229_s1 + $0x64] ss:$16 sps:$4 sm:$0xff]   ;;  %v1599_v23 = vld [vmem:[%s2229_s1 + $0x6c] ss:$16 sps:$4 sm:$0xff]  }
  0x15   : >> { %v1601_v24 = vld [vmem:[%s2229_s1 + $0x60] ss:$16 sps:$4 sm:$0xff]   ;;  %v1602_v25 = vld [vmem:[%s2229_s1 + $0x68] ss:$16 sps:$4 sm:$0xff]   ;;  %v1603_v26 = vld [vmem:[%s2229_s1 + $0x84] ss:$16 sps:$4 sm:$0xff]  }
  0x16   : >> { %v1605_v27 = vld [vmem:[%s2229_s1 + $0x8c] ss:$16 sps:$4 sm:$0xff]   ;;  %v1607_v28 = vld [vmem:[%s2229_s1 + $0x80] ss:$16 sps:$4 sm:$0xff]   ;;  %v1608_v29 = vld [vmem:[%s2229_s1 + $0x88] ss:$16 sps:$4 sm:$0xff]  }
  0x17   : >> { %457 = vmatpush1.bf16.msra.mxu0 %v1589_v16  ;;  %500 = vmatpush1.bf16.msra.mxu1 %v1590_v17  ;;  %v1609_v30 = vld [vmem:[%s2229_s1 + $0xa4] ss:$16 sps:$4 sm:$0xff]   ;;  %v1611_v31 = vld [vmem:[%s2229_s1 + $0xac] ss:$16 sps:$4 sm:$0xff]   ;;  %v1613_v32 = vld [vmem:[%s2229_s1 + $0xa0] ss:$16 sps:$4 sm:$0xff]  }
  0x18   : >> { %458 = vmatprep.subr.bf16.mxu0 %v1591_v18  ;;  %501 = vmatprep.subr.bf16.mxu1 %v1593_v19  ;;  %v1614_v33 = vld [vmem:[%s2229_s1 + $0xa8] ss:$16 sps:$4 sm:$0xff]   ;;  %v1615_v34 = vld [vmem:[%s2229_s1 + $0xc4] ss:$16 sps:$4 sm:$0xff]   ;;  %v1617_v35 = vld [vmem:[%s2229_s1 + $0xcc] ss:$16 sps:$4 sm:$0xff]  }
  0x19   : >> { %v1619_v36 = vld [vmem:[%s2229_s1 + $0xc0] ss:$16 sps:$4 sm:$0xff]   ;;  %v1620_v37 = vld [vmem:[%s2229_s1 + $0xc8] ss:$16 sps:$4 sm:$0xff]   ;;  %v1621_v38 = vld [vmem:[%s2229_s1 + $0xe4] ss:$16 sps:$4 sm:$0xff]  }
  0x1a   : >> { %v1623_v39 = vld [vmem:[%s2229_s1 + $0xec] ss:$16 sps:$4 sm:$0xff]   ;;  %v1625_v40 = vld [vmem:[%s2229_s1 + $0xe0] ss:$16 sps:$4 sm:$0xff]   ;;  %v1626_v41 = vld [vmem:[%s2229_s1 + $0xe8] ss:$16 sps:$4 sm:$0xff]  }
  0x1b   : >> { %459 = vmatpush1.bf16.msra.mxu0 %v1595_v20  ;;  %502 = vmatpush1.bf16.msra.mxu1 %v1596_v21  ;;  %v1629_v42 = vld [vmem:[%s2229_s1 + $0x104] ss:$16 sps:$4 sm:$0xff]   ;;  %v1632_v43 = vld [vmem:[%s2229_s1 + $0x10c] ss:$16 sps:$4 sm:$0xff]   ;;  %v1627_v44 = vld [vmem:[%s2229_s1 + $0x100] ss:$16 sps:$4 sm:$0xff]  }
  0x1c   : >> { %460 = vmatprep.subr.bf16.mxu0 %v1597_v22  ;;  %503 = vmatprep.subr.bf16.mxu1 %v1599_v23  ;;  %v1633_v45 = vld [vmem:[#allocation2] sm:$0xff]   ;;  %v1630_v46 = vld [vmem:[%s2229_s1 + $0x108] ss:$16 sps:$4 sm:$0xff]   ;;  %v1639_v48 = vld [vmem:[%s2229_s1 + $0x12c] ss:$16 sps:$4 sm:$0xff]   ;;  %s1518_s20 = sshll.u32 %s1789_s15, 6 }
  0x1d   : >> { %v1636_v47 = vld [vmem:[%s2229_s1 + $0x124] ss:$16 sps:$4 sm:$0xff]   ;;  %v1634_v49 = vld [vmem:[%s2229_s1 + $0x120] ss:$16 sps:$4 sm:$0xff]   ;;  %v1637_v50 = vld [vmem:[%s2229_s1 + $0x128] ss:$16 sps:$4 sm:$0xff]   ;;  %s2193_s21 = scalar_lea.vmem %s1864_s11, %s1518_s20 }
  0x1e   : >> { %v1642_v51 = vld [vmem:[%s2229_s1 + $0x144] ss:$16 sps:$4 sm:$0xff]   ;;  %v1645_v52 = vld [vmem:[%s2229_s1 + $0x14c] ss:$16 sps:$4 sm:$0xff]   ;;  %v1640_v53 = vld [vmem:[%s2229_s1 + $0x140] ss:$16 sps:$4 sm:$0xff]  }
  0x1f   : >> { %461 = vmatpush1.bf16.msra.mxu0 %v1601_v24  ;;  %504 = vmatpush1.bf16.msra.mxu1 %v1602_v25  ;;  %v1643_v54 = vld [vmem:[%s2229_s1 + $0x148] ss:$16 sps:$4 sm:$0xff]   ;;  %v1648_v55 = vld [vmem:[%s2229_s1 + $0x164] ss:$16 sps:$4 sm:$0xff]   ;;  %v1651_v56 = vld [vmem:[%s2229_s1 + $0x16c] ss:$16 sps:$4 sm:$0xff]  }
  0x20   : >> { %462 = vmatprep.subr.bf16.mxu0 %v1603_v26  ;;  %505 = vmatprep.subr.bf16.mxu1 %v1605_v27  ;;  %v1646_v57 = vld [vmem:[%s2229_s1 + $0x160] ss:$16 sps:$4 sm:$0xff]   ;;  %v1649_v58 = vld [vmem:[%s2229_s1 + $0x168] ss:$16 sps:$4 sm:$0xff]   ;;  %v1654_v59 = vld [vmem:[%s2229_s1 + $0x184] ss:$16 sps:$4 sm:$0xff]  }
  0x21   : >> { %v1657_v60 = vld [vmem:[%s2229_s1 + $0x18c] ss:$16 sps:$4 sm:$0xff]   ;;  %v1652_v61 = vld [vmem:[%s2229_s1 + $0x180] ss:$16 sps:$4 sm:$0xff]   ;;  %v2045_v63 = vld [vmem:[#allocation2 + $0x4] sm:$0xf] }
  0x22   : >> { %v2043_v62 = vld [vmem:[#allocation2] sm:$0xf]  ;;  %v1655_v3 = vld [vmem:[%s2229_s1 + $0x188] ss:$16 sps:$4 sm:$0xff]   ;;  %v1660_v9 = vld [vmem:[%s2229_s1 + $0x1a4] ss:$16 sps:$4 sm:$0xff]  }
  0x23   : >> { %463 = vmatpush1.bf16.msra.mxu0 %v1607_v28  ;;  %506 = vmatpush1.bf16.msra.mxu1 %v1608_v29  ;;  %v1663_v10 = vld [vmem:[%s2229_s1 + $0x1ac] ss:$16 sps:$4 sm:$0xff]   ;;  %v1406_v12 = vcombine.low %v2043_v62, %v2045_v63  ;;  %v1658_v13 = vld [vmem:[%s2229_s1 + $0x1a0] ss:$16 sps:$4 sm:$0xff]   ;;  %v1661_v14 = vld [vmem:[%s2229_s1 + $0x1a8] ss:$16 sps:$4 sm:$0xff]  }
  0x24   : >> { %464 = vmatprep.subr.bf16.mxu0 %v1609_v30  ;;  %507 = vmatprep.subr.bf16.mxu1 %v1611_v31  ;;  %v1666_v15 = vld [vmem:[%s2229_s1 + $0x1c4] ss:$16 sps:$4 sm:$0xff]   ;;  %v2067_v16 = vld [vmem:[#allocation2 + $0x8] ss:$0 sps:$4 sm:$0x11]   ;;  %s1513_s22 = sshll.u32 %s1789_s15, 4 }
  0x25   : >> { %v596_v17 = vshll.u32 %v1406_v12, 16  ;;  %v1669_v18 = vld [vmem:[%s2229_s1 + $0x1cc] ss:$16 sps:$4 sm:$0xff]   ;;  %v1664_v19 = vld [vmem:[%s2229_s1 + $0x1c0] ss:$16 sps:$4 sm:$0xff]   ;;  %v594_v22 = vshrl.u32 %v1406_v12, 16  ;;  %s1257_s23 = scalar_lea.vmem %s1869_s14, %s1513_s22 }
  0x26   : >> { %v1667_v20 = vld [vmem:[%s2229_s1 + $0x1c8] ss:$16 sps:$4 sm:$0xff]   ;;  %v1672_v21 = vld [vmem:[%s2229_s1 + $0x1e4] ss:$16 sps:$4 sm:$0xff]   ;;  %v601_v24 = vshll.u32 %v2067_v16, 16  ;;  %vm1245_vm2 = vcmask 1043456  }
  0x27   : >> { %465 = vmatpush1.bf16.msra.mxu0 %v1613_v32  ;;  %508 = vmatpush1.bf16.msra.mxu1 %v1614_v33  ;;  %v598_v23 = vrot.slane %v596_v17, 1  ;;  %v1675_v25 = vld [vmem:[%s2229_s1 + $0x1ec] ss:$16 sps:$4 sm:$0xff]   ;;  %v1670_v26 = vld [vmem:[%s2229_s1 + $0x1e0] ss:$16 sps:$4 sm:$0xff]   ;;  %vm1251_vm6 = vcmask 1040384  }
  0x28   : >> { %466 = vmatprep.subr.bf16.mxu0 %v1615_v34  ;;  %509 = vmatprep.subr.bf16.mxu1 %v1617_v35  ;;  %v1673_v27 = vld [vmem:[%s2229_s1 + $0x1e8] ss:$16 sps:$4 sm:$0xff]   ;;  %v1678_v28 = vld [vmem:[%s2229_s1 + $0x204] ss:$16 sps:$4 sm:$0xff]   ;;  %v603_v30 = vrot.slane %v601_v24, 1  ;;  %s240_s15 = sadd.s32 1, %s1789_s15  }
  0x29   : >> { %v599_v29 = vor.u32 %v598_v23, %v594_v22  ;;  %v1681_v31 = vld [vmem:[%s2229_s1 + $0x20c] ss:$16 sps:$4 sm:$0xff]   ;;  %vm592_vm0 = vsmask.f32 7424  ;;  %v1676_v32 = vld [vmem:[%s2229_s1 + $0x200] ss:$16 sps:$4 sm:$0xff]   ;;  %v1157_v23 = vmul.f32 %v1781_v7, %v1839_v1 }
  0x2a   : >> { %v1679_v33 = vld [vmem:[%s2229_s1 + $0x208] ss:$16 sps:$4 sm:$0xff]   ;;  %v1686_v35 = vld [vmem:[%s2229_s1 + $0x224] ss:$16 sps:$4 sm:$0xff]   ;;  %vm1246_vm3 = vsmask.f32 7938 }
  0x2b   : >> { %467 = vmatpush1.bf16.msra.mxu0 %v1619_v36  ;;  %510 = vmatpush1.bf16.msra.mxu1 %v1620_v37  ;;  %v604_v34 = vsel %vm592_vm0, %v599_v29, %v603_v30  ;;  %v1689_v36 = vld [vmem:[%s2229_s1 + $0x22c] ss:$16 sps:$4 sm:$0xff]   ;;  %v1684_v37 = vld [vmem:[%s2229_s1 + $0x220] ss:$16 sps:$4 sm:$0xff]   ;;  %vm1222_vm4 = vsmask.f32 256  ;;  %vm1247_vm7 = vmand %vm1245_vm2, %vm1246_vm3 }
  0x2c   : >> { %468 = vmatprep.subr.bf16.mxu0 %v1621_v38  ;;  %511 = vmatprep.subr.bf16.mxu1 %v1623_v39  ;;  %v1687_v38 = vld [vmem:[%s2229_s1 + $0x228] ss:$16 sps:$4 sm:$0xff]   ;;  %v1692_v39 = vld [vmem:[%s2229_s1 + $0x244] ss:$16 sps:$4 sm:$0xff]   ;;  %vm1223_vm5 = vsmask.f32 4368  ;;  %vm1252_vm9 = vmand %vm1251_vm6, %vm1222_vm4 }
  0x2d   : >> { %v251_v24 = vld [vmem:[%s2193_s21 + $0x28] sm:$0xff]  ;;  %vm1224_vm8 = vmor %vm1222_vm4, %vm1223_vm5  ;;  %p237_p4 = scmp.ge.s32.totalorder %s240_s15, 8  }
  0x2f   : >> { %469 = vmatpush1.bf16.msra.mxu0 %v1625_v40  ;;  %512 = vmatpush1.bf16.msra.mxu1 %v1626_v41  ;;  %v1695_v40 = vld [vmem:[%s2229_s1 + $0x24c] ss:$16 sps:$4 sm:$0xff]   ;;  %v1690_v41 = vld [vmem:[%s2229_s1 + $0x240] ss:$16 sps:$4 sm:$0xff]  }
  0x30   : >> { %766 = vmatprep.subr.bf16.mxu0 %v1629_v42  ;;  %809 = vmatprep.subr.bf16.mxu1 %v1632_v43  ;;  %v1693_v42 = vld [vmem:[%s2229_s1 + $0x248] ss:$16 sps:$4 sm:$0xff]   ;;  %v1698_v43 = vld [vmem:[%s2229_s1 + $0x264] ss:$16 sps:$4 sm:$0xff]  }
  0x32   : >> { %487 = vmatmul.mubr.bf16.vlgmr.msra.gmra.mrb[0].mxu0 %v1633_v45  ;;  %530 = vmatmul.mubr.bf16.vlgmr.msra.gmra.mrb[0].mxu1 %v1633_v45  ;;  %v1699_v45 = vld [vmem:[%s2229_s1 + $0x268] ss:$16 sps:$4 sm:$0xff]  }
  0x33   : >> { %767 = vmatpush1.bf16.msra.mxu0 %v1627_v44  ;;  %810 = vmatpush1.bf16.msra.mxu1 %v1630_v46  ;;  %v1696_v44 = vld [vmem:[%s2229_s1 + $0x260] ss:$16 sps:$4 sm:$0xff]   ;;  %v1704_v46 = vld [vmem:[%s2229_s1 + $0x284] ss:$16 sps:$4 sm:$0xff]  }
  0x34   : >> { %768 = vmatprep.subr.bf16.mxu0 %v1636_v47  ;;  %811 = vmatprep.subr.bf16.mxu1 %v1639_v48  ;;  %v1707_v47 = vld [vmem:[%s2229_s1 + $0x28c] ss:$16 sps:$4 sm:$0xff]   ;;  %v1702_v48 = vld [vmem:[%s2229_s1 + $0x280] ss:$16 sps:$4 sm:$0xff]  }
  0x35   : >> { %798 = vmatprep.mubr.bf16.mxu0 %v1792_v11  ;;  %841 = vmatprep.mubr.bf16.mxu1 %v1792_v11 }
  0x37   : >> { %769 = vmatpush1.bf16.msra.mxu0 %v1634_v49  ;;  %812 = vmatpush1.bf16.msra.mxu1 %v1637_v50  ;;  %v1705_v49 = vld [vmem:[%s2229_s1 + $0x288] ss:$16 sps:$4 sm:$0xff]   ;;  %v1710_v50 = vld [vmem:[%s2229_s1 + $0x2a4] ss:$16 sps:$4 sm:$0xff]  }
  0x38   : >> { %770 = vmatprep.subr.bf16.mxu0 %v1642_v51  ;;  %813 = vmatprep.subr.bf16.mxu1 %v1645_v52  ;;  %v1713_v51 = vld [vmem:[%s2229_s1 + $0x2ac] ss:$16 sps:$4 sm:$0xff]   ;;  %v1708_v52 = vld [vmem:[%s2229_s1 + $0x2a0] ss:$16 sps:$4 sm:$0xff]  }
  0x3b   : >> { %771 = vmatpush1.bf16.msra.mxu0 %v1640_v53  ;;  %814 = vmatpush1.bf16.msra.mxu1 %v1643_v54  ;;  %v1711_v53 = vld [vmem:[%s2229_s1 + $0x2a8] ss:$16 sps:$4 sm:$0xff]   ;;  %v1716_v54 = vld [vmem:[%s2229_s1 + $0x2c4] ss:$16 sps:$4 sm:$0xff]  }
  0x3c   : >> { %772 = vmatprep.subr.bf16.mxu0 %v1648_v55  ;;  %815 = vmatprep.subr.bf16.mxu1 %v1651_v56  ;;  %v1719_v55 = vld [vmem:[%s2229_s1 + $0x2cc] ss:$16 sps:$4 sm:$0xff]   ;;  %v860_v56 = vld [vmem:[#allocation2] sm:$0xe] }
  0x3f   : >> { %773 = vmatpush1.bf16.msra.mxu0 %v1646_v57  ;;  %816 = vmatpush1.bf16.msra.mxu1 %v1649_v58  ;;  %v1714_v57 = vld [vmem:[%s2229_s1 + $0x2c0] ss:$16 sps:$4 sm:$0xff]   ;;  %v1717_v58 = vld [vmem:[%s2229_s1 + $0x2c8] ss:$16 sps:$4 sm:$0xff]  }
  0x40   : >> { %774 = vmatprep.subr.bf16.mxu0 %v1654_v59  ;;  %817 = vmatprep.subr.bf16.mxu1 %v1657_v60  ;;  %v1472_v59 = vcombine.low %v860_v56, %v2045_v63  ;;  %v1722_v60 = vld [vmem:[%s2229_s1 + $0x2e4] ss:$16 sps:$4 sm:$0xff]   ;;  %v1723_v63 = vld [vmem:[%s2229_s1 + $0x2e8] ss:$16 sps:$4 sm:$0xff]  }
  0x43   : >> { %775 = vmatpush1.bf16.msra.mxu0 %v1652_v61  ;;  %818 = vmatpush1.bf16.msra.mxu1 %v1655_v3  ;;  %v1725_v61 = vld [vmem:[%s2229_s1 + $0x2ec] ss:$16 sps:$4 sm:$0xff]   ;;  %v1720_v3 = vld [vmem:[%s2229_s1 + $0x2e0] ss:$16 sps:$4 sm:$0xff]  }
  0x44   : >> { %776 = vmatprep.subr.bf16.mxu0 %v1660_v9  ;;  %819 = vmatprep.subr.bf16.mxu1 %v1663_v10  ;;  %v898_v9 = vrot.slane %v1472_v59, 1  ;;  %v899_v10 = vrot.slane %v2067_v16, 1 }
  0x46   : >> { %v900_v12 = vsel %vm897_vm1, %v898_v9, %v899_v10 }
  0x47   : >> { %777 = vmatpush1.bf16.msra.mxu0 %v1658_v13  ;;  %820 = vmatpush1.bf16.msra.mxu1 %v1661_v14  ;;  %v246_v13 = vld [vmem:[%s2193_s21] sm:$0xff]  ;;  %v1156_v14 = vmul.f32 %v1785_v8, %v1834_v0 }
  0x48   : >> { %778 = vmatprep.subr.bf16.mxu0 %v1666_v15  ;;  %821 = vmatprep.subr.bf16.mxu1 %v1669_v18  ;;  %v247_v15 = vld [vmem:[%s2193_s21 + $0x8] sm:$0xff]  ;;  %v1172_v18 = vmul.f32 %v1785_v8, %v1844_v2 }
  0x4b   : >> { %779 = vmatpush1.bf16.msra.mxu0 %v1664_v19  ;;  %822 = vmatpush1.bf16.msra.mxu1 %v1667_v20  ;;  %v250_v19 = vld [vmem:[%s2193_s21 + $0x20] sm:$0xff] }
  0x4c   : >> { %780 = vmatprep.subr.bf16.mxu0 %v1672_v21  ;;  %823 = vmatprep.subr.bf16.mxu1 %v1675_v25 }
  0x4f   : >> { %781 = vmatpush1.bf16.msra.mxu0 %v1670_v26  ;;  %824 = vmatpush1.bf16.msra.mxu1 %v1673_v27 }
  0x50   : >> { %1062 = vmatprep.subr.bf16.mxu0 %v1678_v28  ;;  %1105 = vmatprep.subr.bf16.mxu1 %v1681_v31  ;;  %v1173_v28 = vmul.f32 %v1781_v7, %v1849_v4 }
  0x52   : >> { %799 = vmatmul.mubr.bf16.vlgmr.msra.gmra.mrb[0].mxu0 %v604_v34  ;;  %842 = vmatmul.mubr.bf16.vlgmr.msra.gmra.mrb[0].mxu1 %v604_v34 }
  0x53   : >> { %1063 = vmatpush1.bf16.msra.mxu0 %v1676_v32  ;;  %1106 = vmatpush1.bf16.msra.mxu1 %v1679_v33 }
  0x54   : >> { %1064 = vmatprep.subr.bf16.mxu0 %v1686_v35  ;;  %1107 = vmatprep.subr.bf16.mxu1 %v1689_v36 }
  0x55   : >> { %1094 = vmatprep.mubr.bf16.mxu0 %v1792_v11  ;;  %1137 = vmatprep.mubr.bf16.mxu1 %v1792_v11  ;;  %v1701_v11 = vld [vmem:[%s2229_s1 + $0x26c] ss:$16 sps:$4 sm:$0xff]  }
  0x57   : >> { %1065 = vmatpush1.bf16.msra.mxu0 %v1684_v37  ;;  %1108 = vmatpush1.bf16.msra.mxu1 %v1687_v38 }
  0x58   : >> { %1066 = vmatprep.subr.bf16.mxu0 %v1692_v39  ;;  %1109 = vmatprep.subr.bf16.mxu1 %v1695_v40 }
  0x5b   : >> { %1067 = vmatpush1.bf16.msra.mxu0 %v1690_v41  ;;  %1110 = vmatpush1.bf16.msra.mxu1 %v1693_v42  ;;  %v248_v41 = vld [vmem:[%s2193_s21 + $0x10] sm:$0xff] }
  0x5c   : >> { %1068 = vmatprep.subr.bf16.mxu0 %v1698_v43  ;;  %1111 = vmatprep.subr.bf16.mxu1 %v1701_v11  ;;  %v252_v42 = vld [vmem:[%s2193_s21 + $0x30] sm:$0xff] }
  0x5f   : >> { %1069 = vmatpush1.bf16.msra.mxu0 %v1696_v44  ;;  %1112 = vmatpush1.bf16.msra.mxu1 %v1699_v45 }
  0x60   : >> { %1070 = vmatprep.subr.bf16.mxu0 %v1704_v46  ;;  %1113 = vmatprep.subr.bf16.mxu1 %v1707_v47 }
  0x63   : >> { %1071 = vmatpush1.bf16.msra.mxu0 %v1702_v48  ;;  %1114 = vmatpush1.bf16.msra.mxu1 %v1705_v49 }
  0x64   : >> { %1072 = vmatprep.subr.bf16.mxu0 %v1710_v50  ;;  %1115 = vmatprep.subr.bf16.mxu1 %v1713_v51 }
  0x67   : >> { %1073 = vmatpush1.bf16.msra.mxu0 %v1708_v52  ;;  %1116 = vmatpush1.bf16.msra.mxu1 %v1711_v53 }
  0x68   : >> { %1074 = vmatprep.subr.bf16.mxu0 %v1716_v54  ;;  %1117 = vmatprep.subr.bf16.mxu1 %v1719_v55 }
  0x6b   : >> { %1075 = vmatpush1.bf16.msra.mxu0 %v1714_v57  ;;  %1118 = vmatpush1.bf16.msra.mxu1 %v1717_v58 }
  0x6c   : >> { %1076 = vmatprep.subr.bf16.mxu0 %v1722_v60  ;;  %1119 = vmatprep.subr.bf16.mxu1 %v1725_v61  ;;  %v249_v60 = vld [vmem:[%s2193_s21 + $0x18] sm:$0xff] }
  0x6f   : >> { %1077 = vmatpush1.bf16.msra.mxu0 %v1720_v3  ;;  %1120 = vmatpush1.bf16.msra.mxu1 %v1723_v63  ;;  %v253_v63 = vld [vmem:[%s2193_s21 + $0x38] sm:$0xff] }
  0x72   : >> { %1095 = vmatmul.mubr.bf16.vlgmr.msra.gmra.mrb[0].mxu0 %v900_v12  ;;  %1138 = vmatmul.mubr.bf16.vlgmr.msra.gmra.mrb[0].mxu1 %v900_v12 }
 0x145   : >> { %v1096_v16 = vpop.f32.mrb[0].mxu0  ;;  %v1139_v17 = vpop.f32.mrb[0].mxu1 }
 0x146   : >> { %v1521_v20 = vadd.f32 %v1096_v16, %v246_v13  ;;  %v1098_v21 = vpop.f32.mrb[1].mxu0  ;;  %v1141_v22 = vpop.f32.mrb[1].mxu1  ;;  %v1525_v43 = vadd.f32 %v1139_v17, %v248_v41 }
 0x147   : >> { %v1522_v25 = vadd.f32 %v1098_v21, %v247_v15  ;;  %v1100_v26 = vpop.f32.mrb[2].mxu0  ;;  %v1143_v27 = vpop.f32.mrb[2].mxu1  ;;  %v1526_v9 = vadd.f32 %v1141_v22, %v249_v60 }
 0x148   : >> { %v1158_v29 = vadd.f32 %v1521_v20, %v1156_v14  ;;  %v1523_v30 = vadd.f32 %v1100_v26, %v250_v19  ;;  %v1102_v31 = vpop.f32.mrb[3].mxu0  ;;  %v1145_v32 = vpop.f32.mrb[3].mxu1  ;;  %v1527_v11 = vadd.f32 %v1143_v27, %v252_v42 }
 0x149   : >> { %v1174_v33 = vadd.f32 %v1522_v25, %v1172_v18  ;;  %v1524_v34 = vadd.f32 %v1102_v31, %v251_v24  ;;  %v1528_v13 = vadd.f32 %v1145_v32, %v253_v63 }
 0x14a   : >> { %v1505_v35 = vmul.f32 -1.442695, %v1158_v29  ;;  %v1159_v36 = vadd.f32 %v1523_v30, %v1157_v23 }
 0x14b   : >> { %v1507_v37 = vmul.f32 -1.442695, %v1174_v33  ;;  %v1175_v38 = vadd.f32 %v1524_v34, %v1173_v28 }
 0x14c   : >> { %1727 = vpow2.f32 %v1505_v35  ;;  %v1506_v39 = vmul.f32 -1.442695, %v1159_v36 }
 0x14d   : >> { %1729 = vpow2.f32 %v1507_v37  ;;  %v1508_v40 = vmul.f32 -1.442695, %v1175_v38  ;;  %v1253_v37 = vld [vmem:[#allocation2 + $0x8] sm:$0x1] }
 0x14e   : >> { %1731 = vpow2.f32 %v1506_v39 }
 0x14f   : >> { %1733 = vpow2.f32 %v1508_v40 }
 0x150   : >> { %1735 = vtanh.f32 %v1525_v43 }
 0x151   : >> { %1737 = vtanh.f32 %v1527_v11 }
 0x156   : >> { %v1728_v44 = vpop.eup %1727 }
 0x157   : >> { %v1730_v45 = vpop.eup %1729  ;;  %v1166_v46 = vadd.f32 1.0, %v1728_v44 }
 0x158   : >> { %v1732_v47 = vpop.eup %1731  ;;  %v1182_v48 = vadd.f32 1.0, %v1730_v45 }
 0x159   : >> { %v1734_v49 = vpop.eup %1733  ;;  %1739 = vrcp.f32 %v1166_v46  ;;  %v1167_v50 = vadd.f32 1.0, %v1732_v47 }
 0x15a   : >> { %1741 = vrcp.f32 %v1182_v48  ;;  %v1183_v51 = vadd.f32 1.0, %v1734_v49  ;;  %v1736_v52 = vpop.eup %1735 }
 0x15b   : >> { %1743 = vrcp.f32 %v1167_v50  ;;  %v1738_v53 = vpop.eup %1737 }
 0x15c   : >> { %1745 = vrcp.f32 %v1183_v51 }
 0x163   : >> { %v1740_v54 = vpop.eup %1739 }
 0x164   : >> { %v1742_v55 = vpop.eup %1741  ;;  %v1192_v56 = vmul.f32 %v1740_v54, %v1736_v52 }
 0x165   : >> { %v1744_v57 = vpop.eup %1743  ;;  %v1188_v58 = vmul.f32 %v1785_v8, %v1742_v55 }
 0x166   : >> { %v1746_v59 = vpop.eup %1745  ;;  %v1193_v61 = vmul.f32 %v1744_v57, %v1738_v53 }
 0x167   : >> { %v1194_v8 = vadd.f32 %v1192_v56, %v1188_v58   ;;  %v1189_v3 = vmul.f32 %v1781_v7, %v1746_v59 }
 0x169   : >> { %v1196_v10 = vmul.f32 %v1194_v8, %v1854_v5  ;;  %v1195_v7 = vadd.f32 %v1193_v61, %v1189_v3  }
 0x16b   : >> { %v1198_v12 = vadd.f32 %v1526_v9, %v1196_v10  ;;  %v1197_v14 = vmul.f32 %v1195_v7, %v1859_v6 }
 0x16d   : >> { %v1509_v15 = vmul.f32 -1.442695, %v1198_v12  ;;  %v1199_v16 = vadd.f32 %v1528_v13, %v1197_v14 }
 0x16f   : >> { %1747 = vpow2.f32 %v1509_v15  ;;  %v1510_v17 = vmul.f32 -1.442695, %v1199_v16 }
 0x171   : >> { %1749 = vpow2.f32 %v1510_v17 }
 0x172   : >> { %1751 = vtanh.f32 %v1194_v8 }
 0x179   : >> { %v1748_v18 = vpop.eup %1747 }
 0x17a   : >> { %v1206_v19 = vadd.f32 1.0, %v1748_v18 }
 0x17b   : >> { %v1750_v20 = vpop.eup %1749 }
 0x17c   : >> { %1753 = vrcp.f32 %v1206_v19  ;;  %v1207_v21 = vadd.f32 1.0, %v1750_v20  ;;  %v1752_v22 = vpop.eup %1751 }
 0x17d   : >> { %1755 = vtanh.f32 %v1195_v7 }
 0x17e   : >> { %1757 = vrcp.f32 %v1207_v21 }
 0x186   : >> { %v1754_v23 = vpop.eup %1753 }
 0x187   : >> { %v1756_v24 = vpop.eup %1755  ;;  %v1214_v25 = vmul.f32 %v1754_v23, %v1752_v22 }
 0x188   : >> { %v1758_v26 = vpop.eup %1757 }
 0x189   : >> { %v1519_v27 = vpack.c.bf16 %v1214_v25, %v1214_v25  ;;  %1258 = vst [vmem:[%s1257_s23] sm:$0xff] %v1214_v25  ;;  %v1215_v28 = vmul.f32 %v1758_v26, %v1756_v24 }
 0x18b   : >> { %v1226_v29 = vshrl.u32 %v1519_v27, 16  ;;  %v1520_v30 = vpack.c.bf16 %v1215_v28, %v1215_v28  ;;  %1259 = vst [vmem:[%s1257_s23 + $0x8] sm:$0xff] %v1215_v28  ;;  %v1229_v32 = vshll.u32 %v1519_v27, 16 }
 0x18d   : >> { %v1228_v31 = vrot.slane %v1226_v29, 7  ;;  %v1234_v33 = vshrl.u32 %v1520_v30, 16  ;;  %v1237_v36 = vshll.u32 %v1520_v30, 16 }
 0x18e   : > { %239 = sbr.rel (!%p237_p4) target bundleno = 16 (0x10), region = 81 }
 0x18f   : >> { %v1231_v34 = vor.u32 %v1229_v32, %v1228_v31  ;;  %v1236_v35 = vrot.slane %v1234_v33, 7  ;;  %v1232_v38 = vrot.slane %v1228_v31, 4 }
 0x191   : >> { %v1248_v39 = vsel %vm1247_vm7, %v1231_v34, %v2043_v62  ;;  %v1239_v40 = vor.u32 %v1237_v36, %v1236_v35  ;;  %v1241_v41 = vrot.slane %v1236_v35, 4 }
 0x192   : >> { %1249 = vst [vmem:[#allocation2] sm:$0xf] %v1248_v39 }
 0x193   : >> { %v1240_v42 = vsel %vm1224_vm8, %v1232_v38, %v1239_v40  ;;  %v1254_v43 = vsel %vm1252_vm9, %v1241_v41, %v1253_v37 }
 0x194   : >> { %1250 = vst [vmem:[#allocation2 + $0x4] sm:$0xf] %v1240_v42  ;;  %1255 = vst [vmem:[#allocation2 + $0x8] sm:$0x1] %v1254_v43 }
 0x195 PF: > { %s15_s18 = sadd.s32 1, %s1777_s18  }
 0x196   : > { %p12_p5 = scmp.ge.s32.totalorder %s15_s18, 4  }
 0x198   :  { %14 = sbr.rel (!%p12_p5) target bundleno = 1 (0x1), region = 92 }

</bundles_post_ra>
